<compile_context>
chip_gen: v6e
topology: v6e:2x2x1
jax: 0.10.0
libtpu: 0.0.40
codegen_flags: <defaults>
</compile_context>

<pallas_src>
import functools

import jax
import jax.numpy as jnp
from jax.experimental import pallas as pl
from jax.experimental.pallas import tpu as pltpu

EPS = 1e-5
H1 = 512          # layer-1 width per tower
H2 = 256          # layer-2 width per tower
HEAD_PAD = 128    # head output padded to one full lane group


def _bn_relu(x, gamma, beta):
    # BatchNorm1d in training mode: per-batch mean / biased variance (matches PyTorch).
    mean = jnp.mean(x, axis=0, keepdims=True)
    diff = x - mean
    var = jnp.mean(diff * diff, axis=0, keepdims=True)
    y = diff * jax.lax.rsqrt(var + EPS) * gamma + beta
    return jnp.maximum(y, 0.0)


def _tower_kernel(state_ref, action_ref, ws_ref, wa_ref, bn_ref, w25_ref,
                  whb_ref, out_ref, *, head_dim):
    """One grid step == one critic tower (grid=(2,), 'parallel')."""
    bn = bn_ref[...]                      # (3, H1+H2): rows = [bias; gamma; beta]

    # ---- Layer 1: split state/action matmuls (no lane concat). ----
    h = (jnp.dot(state_ref[...], ws_ref[...], preferred_element_type=jnp.float32)
         + jnp.dot(action_ref[...], wa_ref[...], preferred_element_type=jnp.float32)
         + bn[0:1, :H1])
    h = _bn_relu(h, bn[1:2, :H1], bn[2:3, :H1])

    # ---- Layer 2. ----
    p = jnp.dot(h, w25_ref[...], preferred_element_type=jnp.float32) + bn[0:1, H1:]
    p = _bn_relu(p, bn[1:2, H1:], bn[2:3, H1:])

    # ---- Fused head (q column + softmax logits), padded to 128 lanes. ----
    head = (jnp.dot(p, whb_ref[:H2, :], preferred_element_type=jnp.float32)
            + whb_ref[H2:H2 + 1, :])      # (B, 128); lanes >= head_dim are exactly 0

    col = jax.lax.broadcasted_iota(jnp.int32, head.shape, 1)
    valid = jnp.logical_and(col >= 1, col < head_dim)
    logits = jnp.where(valid, head, -jnp.inf)
    m = jnp.max(logits, axis=1, keepdims=True)
    e = jnp.where(valid, jnp.exp(head - m), 0.0)
    denom = jnp.sum(e, axis=1, keepdims=True)
    # Exact reciprocal: approx rcp (~2^-12 rel err) can exceed the 1e-4 abs tolerance.
    w = e * pl.reciprocal(denom, approx=False)

    # Lane 0 -> q, lanes 1..head_dim-1 -> softmax weights, rest zero. Full-lane store.
    out_ref[...] = jnp.where(col == 0, head, w)


def make_params(key, br_output_dim, action_dim, decomposed_reward_dim):
    """Deterministic synthetic parameter init in PyTorch layout (W as (in, out))."""
    in_dim = br_output_dim + action_dim
    wdim = decomposed_reward_dim + 1
    dims = {
        "w1": (in_dim, 512), "b1": (1, 512),
        "w2": (512, 256), "b2": (1, 256),
        "w3": (256, 1), "b3": (1, 1),
        "w7": (256, wdim), "b7": (1, wdim),
        "w4": (in_dim, 512), "b4": (1, 512),
        "w5": (512, 256), "b5": (1, 256),
        "w6": (256, 1), "b6": (1, 1),
        "w9": (256, wdim), "b9": (1, wdim),
    }
    params = {}
    keys = jax.random.split(key, len(dims))
    for k, (name, shape) in zip(keys, dims.items()):
        fan_in = shape[0] if name.startswith("w") else shape[1]
        scale = 1.0 / jnp.sqrt(jnp.asarray(fan_in, jnp.float32))
        params[name] = jax.random.uniform(k, shape, jnp.float32, -1.0, 1.0) * scale
    # BatchNorm affine params (PyTorch default: gamma=1, beta=0).
    for g, b, d in [("g1", "be1", 512), ("g2", "be2", 256),
                    ("g3", "be3", 512), ("g4", "be4", 256)]:
        params[g] = jnp.ones((1, d), jnp.float32)
        params[b] = jnp.zeros((1, d), jnp.float32)
    return params


def pack_params(p, br_output_dim):
    """One-time packing of PyTorch-layout params into per-tower slabs."""
    S = br_output_dim
    head_dim = 1 + p["w7"].shape[1]                     # q column + softmax columns

    # Layer-1 weights, split by input (state rows / action rows), towers side by side.
    ws = jnp.concatenate([p["w1"][:S], p["w4"][:S]], axis=1)     # (S, 1024)
    wa = jnp.concatenate([p["w1"][S:], p["w4"][S:]], axis=1)     # (A, 1024)

    def tower_bn(b1, g1, be1, b2, g2, be2):
        return jnp.concatenate([
            jnp.concatenate([b1, b2], axis=1),
            jnp.concatenate([g1, g2], axis=1),
            jnp.concatenate([be1, be2], axis=1)], axis=0)        # (3, 768)

    bn = jnp.concatenate([
        tower_bn(p["b1"], p["g1"], p["be1"], p["b2"], p["g2"], p["be2"]),
        tower_bn(p["b4"], p["g3"], p["be3"], p["b5"], p["g4"], p["be4"])],
        axis=1)                                                   # (3, 1536)

    w25 = jnp.concatenate([p["w2"], p["w5"]], axis=1)             # (512, 512)

    def tower_head(wq, ww, bq, bw):
        wh = jnp.zeros((H2, HEAD_PAD), jnp.float32)
        wh = wh.at[:, 0:1].set(wq)
        wh = wh.at[:, 1:head_dim].set(ww)
        bh = jnp.zeros((1, HEAD_PAD), jnp.float32)
        bh = bh.at[:, 0:1].set(bq)
        bh = bh.at[:, 1:head_dim].set(bw)
        return jnp.concatenate([wh, bh], axis=0)                  # (257, 128)

    whb = jnp.stack([tower_head(p["w3"], p["w7"], p["b3"], p["b7"]),
                     tower_head(p["w6"], p["w9"], p["b6"], p["b9"])],
                    axis=0)                                       # (2, 257, 128)

    return {"ws": ws, "wa": wa, "bn": bn, "w25": w25, "whb": whb}, head_dim


@functools.partial(jax.jit, static_argnames=("head_dim",))
def counterfactual_critic_forward(state, action, packed, *, head_dim):
    state = state.astype(jnp.float32)
    action = action.astype(jnp.float32)
    B, S = state.shape
    A = action.shape[1]

    flops = 2 * 2 * B * (S * H1 + A * H1 + H1 * H2 + H2 * HEAD_PAD)
    transcendentals = 2 * (B * HEAD_PAD + H1 + H2)      # exp (padded) + rsqrt per tower
    param_bytes = sum(int(v.size) * 4 for v in packed.values())
    io_bytes = 4 * B * (S + A) + 4 * 2 * B * HEAD_PAD
    cost = pl.CostEstimate(flops=flops, transcendentals=transcendentals,
                           bytes_accessed=param_bytes + io_bytes)

    kernel = functools.partial(_tower_kernel, head_dim=head_dim)

    out = pl.pallas_call(
        kernel,
        out_shape=jax.ShapeDtypeStruct((2, B, HEAD_PAD), jnp.float32),
        grid=(2,),                                       # one step per tower
        in_specs=[
            pl.BlockSpec((B, S), lambda t: (0, 0)),                    # state (shared)
            pl.BlockSpec((B, A), lambda t: (0, 0)),                    # action (shared)
            pl.BlockSpec((S, H1), lambda t: (0, t)),                   # layer-1 W (state rows)
            pl.BlockSpec((A, H1), lambda t: (0, t)),                   # layer-1 W (action rows)
            pl.BlockSpec((3, H1 + H2), lambda t: (0, t)),              # bias/gamma/beta slab
            pl.BlockSpec((H1, H2), lambda t: (0, t)),                  # layer-2 W
            pl.BlockSpec((None, H2 + 1, HEAD_PAD), lambda t: (t, 0, 0)),  # head W + bias
        ],
        out_specs=pl.BlockSpec((None, B, HEAD_PAD), lambda t: (t, 0, 0)),
        compiler_params=pltpu.CompilerParams(dimension_semantics=("parallel",)),
        cost_estimate=cost,
    )(state, action, packed["ws"], packed["wa"], packed["bn"],
      packed["w25"], packed["whb"])

    q1 = out[0, :, 0:1]
    w1 = out[0, :, 1:head_dim]
    q2 = out[1, :, 0:1]
    w2 = out[1, :, 1:head_dim]
    return q1, w1, q2, w2


def _reference_forward(state, action, p):
    sa = jnp.concatenate([state, action], axis=1).astype(jnp.float32)

    def bn_relu(x, g, b):
        m = jnp.mean(x, axis=0, keepdims=True)
        v = jnp.mean((x - m) ** 2, axis=0, keepdims=True)
        return jnp.maximum((x - m) / jnp.sqrt(v + EPS) * g + b, 0.0)

    h1 = bn_relu(sa @ p["w1"] + p["b1"], p["g1"], p["be1"])
    h1p = bn_relu(h1 @ p["w2"] + p["b2"], p["g2"], p["be2"])
    q1 = h1p @ p["w3"] + p["b3"]
    w1 = jax.nn.softmax(h1p @ p["w7"] + p["b7"], axis=1)
    h2 = bn_relu(sa @ p["w4"] + p["b4"], p["g3"], p["be3"])
    h2p = bn_relu(h2 @ p["w5"] + p["b5"], p["g4"], p["be4"])
    q2 = h2p @ p["w6"] + p["b6"]
    w2 = jax.nn.softmax(h2p @ p["w9"] + p["b9"], axis=1)
    return q1, w1, q2, w2


if __name__ == "__main__":
    br_output_dim, action_dim, decomposed_reward_dim = 24, 8, 5
    batch = 8

    key = jax.random.PRNGKey(0)
    k_state, k_action, k_params = jax.random.split(key, 3)
    state = jax.random.normal(k_state, (batch, br_output_dim), jnp.float32)
    action = jax.random.normal(k_action, (batch, action_dim), jnp.float32)
    params = make_params(k_params, br_output_dim, action_dim, decomposed_reward_dim)
    packed, head_dim = pack_params(params, br_output_dim)

    outs = counterfactual_critic_forward(state, action, packed, head_dim=head_dim)
    outs = jax.block_until_ready(outs)

    refs = _reference_forward(state, action, params)
    for o, r in zip(outs, refs):
        assert o.shape == r.shape
        assert float(jnp.max(jnp.abs(o - r))) < 1e-4

    print("KERNEL_OK")
</pallas_src>

<mosaic_0001>
module attributes {stable_mosaic.version = 11 : i64} {
  func.func @_tower_kernel(%arg0: i32, %arg1: memref<8x24xf32, #tpu.memory_space<vmem>>, %arg2: memref<8x8xf32, #tpu.memory_space<vmem>>, %arg3: memref<24x512xf32, #tpu.memory_space<vmem>>, %arg4: memref<8x512xf32, #tpu.memory_space<vmem>>, %arg5: memref<3x768xf32, #tpu.memory_space<vmem>>, %arg6: memref<512x256xf32, #tpu.memory_space<vmem>>, %arg7: memref<1x257x128xf32, #tpu.memory_space<vmem>>, %arg8: memref<1x8x128xf32, #tpu.memory_space<vmem>>) attributes {dimension_semantics = [#tpu.dimension_semantics<parallel>], iteration_bounds = array<i64: 2>, scalar_prefetch = 0 : i64, scratch_operands = 0 : i64, tpu.core_type = #tpu.core_type<tc>, window_params = [{pipeline_mode = #tpu.pipeline_mode<synchronous>, transform_indices = @transform_0, window_bounds = array<i64: 8, 24>}, {pipeline_mode = #tpu.pipeline_mode<synchronous>, transform_indices = @transform_1, window_bounds = array<i64: 8, 8>}, {transform_indices = @transform_2, window_bounds = array<i64: 24, 512>}, {transform_indices = @transform_3, window_bounds = array<i64: 8, 512>}, {transform_indices = @transform_4, window_bounds = array<i64: 3, 768>}, {transform_indices = @transform_5, window_bounds = array<i64: 512, 256>}, {transform_indices = @transform_6, window_bounds = array<i64: 1, 257, 128>}, {transform_indices = @transform_7, window_bounds = array<i64: 1, 8, 128>}]} {
    %c0 = arith.constant 0 : index
    %c0_0 = arith.constant 0 : index
    %0 = vector.load %arg5[%c0, %c0_0] : memref<3x768xf32, #tpu.memory_space<vmem>>, vector<3x768xf32>
    %c0_1 = arith.constant 0 : index
    %c0_2 = arith.constant 0 : index
    %1 = vector.load %arg1[%c0_1, %c0_2] : memref<8x24xf32, #tpu.memory_space<vmem>>, vector<8x24xf32>
    %c0_3 = arith.constant 0 : index
    %c0_4 = arith.constant 0 : index
    %2 = vector.load %arg3[%c0_3, %c0_4] : memref<24x512xf32, #tpu.memory_space<vmem>>, vector<24x512xf32>
    %cst = arith.constant dense<0.000000e+00> : vector<8x512xf32>
    %3 = tpu.matmul %1, %2, %cst {dimension_numbers = #tpu.dot_dimension_numbers<[1], [0], [0], [1], [0, 0, 1, 1], [], []>} : vector<8x24xf32>, vector<24x512xf32>, vector<8x512xf32> -> vector<8x512xf32>
    %c0_5 = arith.constant 0 : index
    %c0_6 = arith.constant 0 : index
    %4 = vector.load %arg2[%c0_5, %c0_6] : memref<8x8xf32, #tpu.memory_space<vmem>>, vector<8x8xf32>
    %c0_7 = arith.constant 0 : index
    %c0_8 = arith.constant 0 : index
    %5 = vector.load %arg4[%c0_7, %c0_8] : memref<8x512xf32, #tpu.memory_space<vmem>>, vector<8x512xf32>
    %cst_9 = arith.constant dense<0.000000e+00> : vector<8x512xf32>
    %6 = tpu.matmul %4, %5, %cst_9 {dimension_numbers = #tpu.dot_dimension_numbers<[1], [0], [0], [1], [0, 0, 1, 1], [], []>} : vector<8x8xf32>, vector<8x512xf32>, vector<8x512xf32> -> vector<8x512xf32>
    %7 = arith.addf %3, %6 : vector<8x512xf32>
    %8 = vector.extract_strided_slice %0 {offsets = [0, 0], sizes = [1, 512], strides = [1, 1]} : vector<3x768xf32> to vector<1x512xf32>
    %9 = vector.broadcast %8 : vector<1x512xf32> to vector<8x512xf32>
    %10 = arith.addf %7, %9 : vector<8x512xf32>
    %11 = vector.extract_strided_slice %0 {offsets = [1, 0], sizes = [1, 512], strides = [1, 1]} : vector<3x768xf32> to vector<1x512xf32>
    %12 = vector.extract_strided_slice %0 {offsets = [2, 0], sizes = [1, 512], strides = [1, 1]} : vector<3x768xf32> to vector<1x512xf32>
    %cst_10 = arith.constant dense<0.000000e+00> : vector<512xf32>
    %13 = vector.multi_reduction <add>, %10, %cst_10 [0] : vector<8x512xf32> to vector<512xf32>
    %14 = vector.shape_cast %13 : vector<512xf32> to vector<1x512xf32>
    %cst_11 = arith.constant 8.000000e+00 : f32
    %15 = vector.broadcast %cst_11 : f32 to vector<1x512xf32>
    %16 = arith.divf %14, %15 : vector<1x512xf32>
    %17 = vector.broadcast %16 : vector<1x512xf32> to vector<8x512xf32>
    %18 = arith.subf %10, %17 : vector<8x512xf32>
    %19 = arith.mulf %18, %18 : vector<8x512xf32>
    %cst_12 = arith.constant dense<0.000000e+00> : vector<512xf32>
    %20 = vector.multi_reduction <add>, %19, %cst_12 [0] : vector<8x512xf32> to vector<512xf32>
    %21 = vector.shape_cast %20 : vector<512xf32> to vector<1x512xf32>
    %cst_13 = arith.constant 8.000000e+00 : f32
    %22 = vector.broadcast %cst_13 : f32 to vector<1x512xf32>
    %23 = arith.divf %21, %22 : vector<1x512xf32>
    %cst_14 = arith.constant 9.99999974E-6 : f32
    %24 = vector.broadcast %cst_14 : f32 to vector<1x512xf32>
    %25 = arith.addf %23, %24 : vector<1x512xf32>
    %26 = math.rsqrt %25 : vector<1x512xf32>
    %27 = vector.broadcast %26 : vector<1x512xf32> to vector<8x512xf32>
    %28 = arith.mulf %18, %27 : vector<8x512xf32>
    %29 = vector.broadcast %11 : vector<1x512xf32> to vector<8x512xf32>
    %30 = arith.mulf %28, %29 : vector<8x512xf32>
    %31 = vector.broadcast %12 : vector<1x512xf32> to vector<8x512xf32>
    %32 = arith.addf %30, %31 : vector<8x512xf32>
    %cst_15 = arith.constant 0.000000e+00 : f32
    %33 = vector.broadcast %cst_15 : f32 to vector<8x512xf32>
    %34 = arith.maximumf %32, %33 : vector<8x512xf32>
    %c0_16 = arith.constant 0 : index
    %c0_17 = arith.constant 0 : index
    %35 = vector.load %arg6[%c0_16, %c0_17] : memref<512x256xf32, #tpu.memory_space<vmem>>, vector<512x256xf32>
    %cst_18 = arith.constant dense<0.000000e+00> : vector<8x256xf32>
    %36 = tpu.matmul %34, %35, %cst_18 {dimension_numbers = #tpu.dot_dimension_numbers<[1], [0], [0], [1], [0, 0, 1, 1], [], []>} : vector<8x512xf32>, vector<512x256xf32>, vector<8x256xf32> -> vector<8x256xf32>
    %37 = vector.extract_strided_slice %0 {offsets = [0, 512], sizes = [1, 256], strides = [1, 1]} : vector<3x768xf32> to vector<1x256xf32>
    %38 = vector.broadcast %37 : vector<1x256xf32> to vector<8x256xf32>
    %39 = arith.addf %36, %38 : vector<8x256xf32>
    %40 = vector.extract_strided_slice %0 {offsets = [1, 512], sizes = [1, 256], strides = [1, 1]} : vector<3x768xf32> to vector<1x256xf32>
    %41 = vector.extract_strided_slice %0 {offsets = [2, 512], sizes = [1, 256], strides = [1, 1]} : vector<3x768xf32> to vector<1x256xf32>
    %cst_19 = arith.constant dense<0.000000e+00> : vector<256xf32>
    %42 = vector.multi_reduction <add>, %39, %cst_19 [0] : vector<8x256xf32> to vector<256xf32>
    %43 = vector.shape_cast %42 : vector<256xf32> to vector<1x256xf32>
    %cst_20 = arith.constant 8.000000e+00 : f32
    %44 = vector.broadcast %cst_20 : f32 to vector<1x256xf32>
    %45 = arith.divf %43, %44 : vector<1x256xf32>
    %46 = vector.broadcast %45 : vector<1x256xf32> to vector<8x256xf32>
    %47 = arith.subf %39, %46 : vector<8x256xf32>
    %48 = arith.mulf %47, %47 : vector<8x256xf32>
    %cst_21 = arith.constant dense<0.000000e+00> : vector<256xf32>
    %49 = vector.multi_reduction <add>, %48, %cst_21 [0] : vector<8x256xf32> to vector<256xf32>
    %50 = vector.shape_cast %49 : vector<256xf32> to vector<1x256xf32>
    %cst_22 = arith.constant 8.000000e+00 : f32
    %51 = vector.broadcast %cst_22 : f32 to vector<1x256xf32>
    %52 = arith.divf %50, %51 : vector<1x256xf32>
    %cst_23 = arith.constant 9.99999974E-6 : f32
    %53 = vector.broadcast %cst_23 : f32 to vector<1x256xf32>
    %54 = arith.addf %52, %53 : vector<1x256xf32>
    %55 = math.rsqrt %54 : vector<1x256xf32>
    %56 = vector.broadcast %55 : vector<1x256xf32> to vector<8x256xf32>
    %57 = arith.mulf %47, %56 : vector<8x256xf32>
    %58 = vector.broadcast %40 : vector<1x256xf32> to vector<8x256xf32>
    %59 = arith.mulf %57, %58 : vector<8x256xf32>
    %60 = vector.broadcast %41 : vector<1x256xf32> to vector<8x256xf32>
    %61 = arith.addf %59, %60 : vector<8x256xf32>
    %cst_24 = arith.constant 0.000000e+00 : f32
    %62 = vector.broadcast %cst_24 : f32 to vector<8x256xf32>
    %63 = arith.maximumf %61, %62 : vector<8x256xf32>
    %c0_25 = arith.constant 0 : index
    %c0_26 = arith.constant 0 : index
    %c0_27 = arith.constant 0 : index
    %64 = vector.load %arg7[%c0_25, %c0_26, %c0_27] : memref<1x257x128xf32, #tpu.memory_space<vmem>>, vector<1x256x128xf32>
    %65 = vector.shape_cast %64 : vector<1x256x128xf32> to vector<256x128xf32>
    %cst_28 = arith.constant dense<0.000000e+00> : vector<8x128xf32>
    %66 = tpu.matmul %63, %65, %cst_28 {dimension_numbers = #tpu.dot_dimension_numbers<[1], [0], [0], [1], [0, 0, 1, 1], [], []>} : vector<8x256xf32>, vector<256x128xf32>, vector<8x128xf32> -> vector<8x128xf32>
    %c0_29 = arith.constant 0 : index
    %c256 = arith.constant 256 : index
    %c0_30 = arith.constant 0 : index
    %67 = vector.load %arg7[%c0_29, %c256, %c0_30] : memref<1x257x128xf32, #tpu.memory_space<vmem>>, vector<1x1x128xf32>
    %68 = vector.shape_cast %67 : vector<1x1x128xf32> to vector<1x128xf32>
    %69 = vector.broadcast %68 : vector<1x128xf32> to vector<8x128xf32>
    %70 = arith.addf %66, %69 : vector<8x128xf32>
    %71 = tpu.iota {dimensions = array<i32: 1>} : vector<8x128xi32>
    %c1_i32 = arith.constant 1 : i32
    %72 = vector.broadcast %c1_i32 : i32 to vector<8x128xi32>
    %73 = arith.cmpi sge, %71, %72 : vector<8x128xi32>
    %c7_i32 = arith.constant 7 : i32
    %74 = vector.broadcast %c7_i32 : i32 to vector<8x128xi32>
    %75 = arith.cmpi slt, %71, %74 : vector<8x128xi32>
    %76 = arith.andi %73, %75 : vector<8x128xi1>
    %cst_31 = arith.constant 0xFF800000 : f32
    %77 = vector.broadcast %cst_31 : f32 to vector<8x128xf32>
    %78 = arith.select %76, %70, %77 : vector<8x128xi1>, vector<8x128xf32>
    %cst_32 = arith.constant dense<0xFF800000> : vector<8xf32>
    %79 = vector.multi_reduction <maximumf>, %78, %cst_32 [1] : vector<8x128xf32> to vector<8xf32>
    %80 = vector.shape_cast %79 : vector<8xf32> to vector<8x1xf32>
    %81 = vector.broadcast %80 : vector<8x1xf32> to vector<8x128xf32>
    %82 = arith.subf %70, %81 : vector<8x128xf32>
    %83 = math.exp %82 : vector<8x128xf32>
    %cst_33 = arith.constant 0.000000e+00 : f32
    %84 = vector.broadcast %cst_33 : f32 to vector<8x128xf32>
    %85 = arith.select %76, %83, %84 : vector<8x128xi1>, vector<8x128xf32>
    %cst_34 = arith.constant dense<0.000000e+00> : vector<8xf32>
    %86 = vector.multi_reduction <add>, %85, %cst_34 [1] : vector<8x128xf32> to vector<8xf32>
    %87 = vector.shape_cast %86 : vector<8xf32> to vector<8x1xf32>
    %88 = tpu.reciprocal %87 : vector<8x1xf32> -> vector<8x1xf32>
    %89 = vector.broadcast %88 : vector<8x1xf32> to vector<8x128xf32>
    %90 = arith.mulf %85, %89 : vector<8x128xf32>
    %c0_i32 = arith.constant 0 : i32
    %91 = vector.broadcast %c0_i32 : i32 to vector<8x128xi32>
    %92 = arith.cmpi eq, %71, %91 : vector<8x128xi32>
    %93 = arith.select %92, %70, %90 : vector<8x128xi1>, vector<8x128xf32>
    %c0_35 = arith.constant 0 : index
    %c0_36 = arith.constant 0 : index
    %c0_37 = arith.constant 0 : index
    %94 = vector.load %arg8[%c0_35, %c0_36, %c0_37] : memref<1x8x128xf32, #tpu.memory_space<vmem>>, vector<1x8x128xf32>
    %95 = vector.shape_cast %94 : vector<1x8x128xf32> to vector<8x128xf32>
    %96 = vector.shape_cast %93 : vector<8x128xf32> to vector<1x8x128xf32>
    tpu.vector_store %arg8[%c0_35, %c0_36, %c0_37], %96 {strides = array<i32>} : memref<1x8x128xf32, #tpu.memory_space<vmem>>, vector<1x8x128xf32>,
    return
  }
  func.func @transform_0(%arg0: i32) -> (i32, i32) {
    %c0_i32 = arith.constant 0 : i32
    %c0_i32_0 = arith.constant 0 : i32
    %c0_i32_1 = arith.constant 0 : i32
    return %c0_i32, %c0_i32_0 : i32, i32
  }
  func.func @transform_1(%arg0: i32) -> (i32, i32) {
    %c0_i32 = arith.constant 0 : i32
    %c0_i32_0 = arith.constant 0 : i32
    %c0_i32_1 = arith.constant 0 : i32
    return %c0_i32, %c0_i32_0 : i32, i32
  }
  func.func @transform_2(%arg0: i32) -> (i32, i32) {
    %c0_i32 = arith.constant 0 : i32
    %c0_i32_0 = arith.constant 0 : i32
    return %c0_i32, %arg0 : i32, i32
  }
  func.func @transform_3(%arg0: i32) -> (i32, i32) {
    %c0_i32 = arith.constant 0 : i32
    %c0_i32_0 = arith.constant 0 : i32
    return %c0_i32, %arg0 : i32, i32
  }
  func.func @transform_4(%arg0: i32) -> (i32, i32) {
    %c0_i32 = arith.constant 0 : i32
    %c0_i32_0 = arith.constant 0 : i32
    return %c0_i32, %arg0 : i32, i32
  }
  func.func @transform_5(%arg0: i32) -> (i32, i32) {
    %c0_i32 = arith.constant 0 : i32
    %c0_i32_0 = arith.constant 0 : i32
    return %c0_i32, %arg0 : i32, i32
  }
  func.func @transform_6(%arg0: i32) -> (i32, i32, i32) {
    %c0_i32 = arith.constant 0 : i32
    %c0_i32_0 = arith.constant 0 : i32
    %c0_i32_1 = arith.constant 0 : i32
    return %arg0, %c0_i32, %c0_i32_0 : i32, i32, i32
  }
  func.func @transform_7(%arg0: i32) -> (i32, i32, i32) {
    %c0_i32 = arith.constant 0 : i32
    %c0_i32_0 = arith.constant 0 : i32
    %c0_i32_1 = arith.constant 0 : i32
    return %arg0, %c0_i32, %c0_i32_0 : i32, i32, i32
  }
}

</mosaic_0001>

<bundles_post_ra>
// kernel: counterfactual_critic_forward.1
= control target key start
LH: loop header
LB: loop body
LE: loop exit
PB: predicated region body
PF: predicated region fallthrough
CT: control target
= control target key end

     0   :  { %12 = vsyncpa [#allocation4], 0  ;;  %s2182_s0 = inlined_call_operand.vmem [shape: f32[8,24], index: 0, kind: input, shape index: {}]   ;;  %s2183_s1 = inlined_call_operand.vmem [shape: f32[8,8], index: 1, kind: input, shape index: {}]   ;;  %s2184_s2 = inlined_call_operand.vmem [shape: f32[24,1024], index: 2, kind: input, shape index: {}]   ;;  %s2185_s3 = inlined_call_operand.vmem [shape: f32[8,1024], index: 3, kind: input, shape index: {}]   ;;  %s2186_s4 = inlined_call_operand.vmem [shape: f32[3,1536], index: 4, kind: input, shape index: {}]   ;;  %s2187_s5 = inlined_call_operand.hbm [shape: f32[512,512], index: 5, kind: input, shape index: {}]   ;;  %s2188_s6 = inlined_call_operand.vmem [shape: f32[2,257,128], index: 6, kind: input, shape index: {}]   ;;  %s2189_s7 = inlined_call_operand.vmem [shape: f32[2,8,128], index: 7, kind: output, shape index: {}]  }
   0x1   :  { %14 = vsyncpa [#allocation4 + $0x1], 0  ;;  %s1778_s24 = smov 0   ;;  %s1780_s25 = smov 0  }
   0x2   :  { %s1782_s26 = smov 0   ;;  %s1784_s27 = smov 0  }
   0x3 LB: > { %s1797_s28 = sadd.s32 4294967295, %s1731_s27   ;;  %s1800_s29 = sadd.s32 1, %s1731_s27   ;;  %s1731_s27 = sphi %s1784_s27, %s2195_s27   ;;  %s1727_s26 = sphi %s1782_s26, %s2194_s26   ;;  %s1723_s25 = sphi %s1780_s25, %s2193_s25   ;;  %s1719_s24 = sphi %s1778_s24, %s2192_s24  }
   0x4   : > { %s66_s30 = ssub.s32 %s1731_s27, %s1800_s29  ;;  %s69_s8 = sadd.s32 1, %s1727_s26 }
   0x5   : > { %p67_p0 = scmp.eq.s32.totalorder %s66_s30, 0  ;;  %p76_p1 = scmp.ne.s32.totalorder %s1727_s26, %s1723_s25 }
   0x6   : > { %p77_p2 = scmp.eq.s32.totalorder %s1731_s27, 0  ;;  %p160_p3 = scmp.ne.s32.totalorder %s1723_s25, %s1719_s24 }
   0x7   : > { %s1810_s9 = scalar_select %p67_p0, %s1727_s26, %s69_s8  }
   0x8   : > { %p1812_p4 = por %p77_p2, %p76_p1  ;;  %p161_p5 = scmp.eq.s32.totalorder %s1797_s28, 0 }
   0x9   : > { %p1557_p7 = scmp.ge.s32.totalorder %s1731_s27, 2 }
   0xa   : > { %p1817_p6 = por %p161_p5, %p160_p3 }
   0xb   : > { %238 = sbr.rel (%p1557_p7) target bundleno = 53 (0x35), region = 24 }
  0x10   : > { %241 = sbr.rel (!%p1812_p4) target bundleno = 27 (0x1b), region = 28  ;;  %s243_s12 = sand.u32 (%p1812_p4), 1, %s1727_s26  }
  0x11   : > { %s1577_s13 = sshll.u32 (%p1812_p4), %s1731_s27, 5  ;;  %s1614_s14 = smul.u32 (%p1812_p4), 96, %s243_s12 }
  0x12   : > { %s248_s17 = scalar_lea.vmem (%p1812_p4), %s2184_s2, %s1577_s13 }
  0x13   : > { %v261_v0 = vld [vmem:[%s248_s17] sm:$0xff] (%p1812_p4)  ;;  %v263_v1 = vld [vmem:[%s248_s17 + $0x8] sm:$0xff] (%p1812_p4)  ;;  %v265_v2 = vld [vmem:[%s248_s17 + $0x10] sm:$0xff] (%p1812_p4)  ;;  %s245_s18 = scalar_lea.vmem (%p1812_p4), [#allocation2], %s1614_s14 }
  0x14   : > { %v267_v3 = vld [vmem:[%s248_s17 + $0x18] sm:$0xff] (%p1812_p4)  ;;  %v269_v4 = vld [vmem:[%s248_s17 + $0x40] sm:$0xff] (%p1812_p4)  ;;  %v271_v5 = vld [vmem:[%s248_s17 + $0x48] sm:$0xff] (%p1812_p4)  ;;  %262 = vst [vmem:[%s245_s18] sm:$0xff] (%p1812_p4), %v261_v0 }
  0x15   : > { %264 = vst [vmem:[%s245_s18 + $0x8] sm:$0xff] %v263_v1  ;;  %266 = vst [vmem:[%s245_s18 + $0x10] sm:$0xff] %v265_v2  ;;  %v273_v6 = vld [vmem:[%s248_s17 + $0x50] sm:$0xff]  ;;  %v275_v7 = vld [vmem:[%s248_s17 + $0x58] sm:$0xff] }
  0x16   : > { %268 = vst [vmem:[%s245_s18 + $0x18] sm:$0xff] %v267_v3  ;;  %270 = vst [vmem:[%s245_s18 + $0x20] sm:$0xff] %v269_v4  ;;  %v277_v8 = vld [vmem:[%s248_s17 + $0x80] sm:$0xff]  ;;  %v279_v9 = vld [vmem:[%s248_s17 + $0x88] sm:$0xff] }
  0x17   : > { %272 = vst [vmem:[%s245_s18 + $0x28] sm:$0xff] %v271_v5  ;;  %274 = vst [vmem:[%s245_s18 + $0x30] sm:$0xff] %v273_v6  ;;  %v281_v10 = vld [vmem:[%s248_s17 + $0x90] sm:$0xff]  ;;  %v283_v11 = vld [vmem:[%s248_s17 + $0x98] sm:$0xff] }
  0x18   : > { %276 = vst [vmem:[%s245_s18 + $0x38] sm:$0xff] %v275_v7  ;;  %278 = vst [vmem:[%s245_s18 + $0x40] sm:$0xff] %v277_v8 }
  0x19   : > { %280 = vst [vmem:[%s245_s18 + $0x48] sm:$0xff] %v279_v9  ;;  %282 = vst [vmem:[%s245_s18 + $0x50] sm:$0xff] %v281_v10 }
  0x1a   : > { %284 = vst [vmem:[%s245_s18 + $0x58] sm:$0xff] %v283_v11 }
  0x1b PF: > { %s309_s19 = sand.u32 1, %s1727_s26   ;;  %s1578_s20 = sshll.u32 %s1731_s27, 8 }
  0x1c   : > { %s1560_s21 = sshll.u32 %s309_s19, 10  ;;  %s1834_s24 = scalar_lea.hbm %s2187_s5, %s1578_s20 }
  0x1d   : > { %s313_s30 = scalar_lea.vmem [#allocation3], %s1560_s21  ;;  %s1838_s12 = scalar_lea.sflag [#allocation4], %s309_s19 }
  0x1e   : > { %s320_s8 = sshll.u32 %s313_s30, 4  ;;  %s1671_s13 = scalar_lea.hbm %s1834_s24, 16384  ;;  %s1836_s8 = int_to_ptr.vmem [resolvable:$true] %s320_s8 }
  0x1f   : > { %p1672_p8 = scmp.ne.s32.totalorder %s1834_s24, %s1671_s13  ;;  %s1675_s16 = scalar_lea.hbm %s2187_s5, 32768 }
  0x20   : > { %p1676_p11 = scmp.lt.s32.totalorder %s1834_s24, %s2187_s5  ;;  %p1677_p12 = scmp.lt.s32.totalorder %s1675_s16, %s1671_s13 }
  0x21   : > { %p1673_p9 = pnand %p1672_p8, %p1812_p4 }
  0x22   : > { %p1678_p13 = por %p1677_p12, %p1676_p11 }
  0x23   : > { %p1674_p10 = pneg %p1673_p9 }
  0x25   : > { %p1679_p0 = pnand %p1678_p13, %p1674_p10 }
  0x27   : > { %1682 = shalt.err (!%p1679_p0)
}
  0x28   : > { %s1683_s19 = scalar_lea.vmem %s1836_s8, 16384  ;;  %s1733_s20 = smov [#allocation3]  }
  0x29   : > { %p1684_p1 = scmp.ne.s32.totalorder %s1836_s8, %s1683_s19  ;;  %s1687_s21 = sshll.u32 %s1733_s20, 4  ;;  %s1688_s21 = int_to_ptr.vmem [resolvable:$false] %s1687_s21 }
  0x2a   : > { %s1689_s22 = scalar_lea.vmem %s1688_s21, 32768  ;;  %p1690_p5 = scmp.lt.s32.totalorder %s1836_s8, %s1688_s21 }
  0x2b   : > { %p1685_p2 = pnand %p1684_p1, %p1812_p4  ;;  %p1691_p7 = scmp.lt.s32.totalorder %s1689_s22, %s1683_s19 }
  0x2d   : > { %p1686_p3 = pneg %p1685_p2  ;;  %p1692_p8 = por %p1691_p7, %p1690_p5 }
  0x2f   : > { %p1693_p9 = pnand %p1692_p8, %p1686_p3 }
  0x31   : > { %1696 = shalt.err (!%p1693_p9)
}
  0x32   : > { %s1734_s23 = smov 512   ;;  %s1735_s30 = smov 256  }
  0x33   : > { %s1736_s13 = smov 16  }
  0x34   : > { %1617 = dma.hbm_to_vmem [thread:$0]  (%p1812_p4), %s1834_s24, 16384, %s1836_s8, %s1838_s12, %s1734_s23, %s1735_s30, %s1736_s13  }
  0x35 PF: > { %p1563_p10 = scmp.ge.s32.totalorder %s1731_s27, 1  ;;  %p336_p11 = scmp.lt.s32.totalorder %s1731_s27, 3 }
  0x37   : > { %p337_p12 = pnand %p1563_p10, %p336_p11 }
  0x38   : > { %s343_s14 = sand.u32 (!%p337_p12), 1, %s1723_s25  }
  0x39   : > { %340 = sbr.rel (%p337_p12) target bundleno = 1111 (0x457), region = 67  ;;  %s1564_s16 = sshll.u32 (!%p337_p12), %s343_s14, 10 }
  0x3a   : > { %s1615_s15 = smul.u32 (!%p337_p12), 96, %s343_s14  ;;  %s350_s18 = scalar_lea.sflag (!%p337_p12), [#allocation4], %s343_s14 }
  0x3b   : > { %s1866_s19 = scalar_lea.vmem (!%p337_p12), [#allocation3], %s1564_s16 }
  0x3c   : > { %s1864_s17 = scalar_lea.vmem (!%p337_p12), [#allocation2], %s1615_s15 }
  0x3e   : > { %1714 = dma.done.wait (%p1817_p6), %s350_s18, 16384  }
  0x3f   : > { %1716 = vsyncadd (%p1817_p6), %s350_s18, 4294950912  ;;  %s1565_s27 = sshll.u32 %s1797_s28, 2  ;;  %v1737_v12 = vmov 0.0   ;;  %v441_v15 = vld [vmem:[%s2183_s1] sm:$0xff]  ;;  %vm446_vm0 = vcmask 64512   ;;  %v438_v18 = vld [vmem:[%s1864_s17 + $0x48] sm:$0xff] }
  0x40   : > { %p404_p4 = scmp.lt.s32.totalorder %s1565_s27, 7  ;;  %514 = vmatprep.mubr.f32.mxu1 %v1737_v12  ;;  %v437_v19 = vld [vmem:[%s1864_s17 + $0x40] sm:$0xff]  ;;  %v434_v20 = vld [vmem:[%s1864_s17 + $0x28] sm:$0xff]  ;;  %vm592_vm1 = vcmask 195584   ;;  %v440_v25 = vld [vmem:[%s1864_s17 + $0x58] sm:$0xff]  ;;  %s409_s23 = smul.u32 6, %s1797_s28 }
  0x41   : > { %v433_v21 = vld [vmem:[%s1864_s17 + $0x20] sm:$0xff]  ;;  %v430_v22 = vld [vmem:[%s1864_s17 + $0x8] sm:$0xff]  ;;  %v439_v26 = vld [vmem:[%s1864_s17 + $0x50] sm:$0xff]  ;;  %p416_p13 = scmp.lt.s32.totalorder %s1797_s28, 1 }
  0x42   : > { %s2197_s27 = smov (!%p404_p4, %s1565_s27), 7  ;;  %v429_v23 = vld [vmem:[%s1864_s17] sm:$0xff]  ;;  %v436_v27 = vld [vmem:[%s1864_s17 + $0x38] sm:$0xff]  ;;  %v435_v28 = vld [vmem:[%s1864_s17 + $0x30] sm:$0xff]  ;;  %p410_p6 = scmp.lt.s32.totalorder %s409_s23, 11 }
  0x43   : > { %s1566_s10 = sshll.u32 %s2197_s27, 3  ;;  %v428_v24 = vld [vmem:[%s2182_s0] sm:$0xff]  ;;  %v432_v29 = vld [vmem:[%s1864_s17 + $0x18] sm:$0xff]  ;;  %v431_v30 = vld [vmem:[%s1864_s17 + $0x10] sm:$0xff]  ;;  %s2201_s28 = smov (!%p416_p13, %s1797_s28), 1 }
  0x44   : > { %s407_s12 = scalar_lea.vmem %s2185_s3, %s1566_s10  ;;  %v972_v31 = vld [vmem:[%s1866_s19 + $0xf8] sm:$0xff]  ;;  %v971_v32 = vld [vmem:[%s1866_s19 + $0xf0] sm:$0xff]  ;;  %v970_v33 = vld [vmem:[%s1866_s19 + $0xe8] sm:$0xff]  ;;  %s2199_s23 = smov (!%p410_p6, %s409_s23), 11 }
  0x45   : > { %v443_v13 = vld [vmem:[%s407_s12 + $0x8] sm:$0xff]  ;;  %v442_v14 = vld [vmem:[%s407_s12] sm:$0xff]  ;;  %v445_v16 = vld [vmem:[%s407_s12 + $0x18] sm:$0xff]  ;;  %1088 = vmatprep.subr.mxu0 %v972_v31  ;;  %s1567_s30 = sshll.u32 %s2199_s23, 2  ;;  %s1616_s16 = smul.u32 264, %s2201_s28 }
  0x46   : > { %480 = vmatprep.subr.mxu1 %v443_v13  ;;  %v444_v17 = vld [vmem:[%s407_s12 + $0x10] sm:$0xff]  ;;  %1089 = vmatpush1.msra.mxu0 %v971_v32  ;;  %v969_v34 = vld [vmem:[%s1866_s19 + $0xe0] sm:$0xff]  ;;  %v968_v35 = vld [vmem:[%s1866_s19 + $0xd8] sm:$0xff]  ;;  %s2031_s15 = scalar_lea.vmem %s2186_s4, %s1567_s30  ;;  %s1569_s27 = sshll.u32 %s2201_s28, 3 }
  0x47   : > { %481 = vmatpush1.msra.mxu1 %v442_v14  ;;  %1090 = vmatprep.subr.mxu0 %v970_v33  ;;  %v967_v36 = vld [vmem:[%s1866_s19 + $0xd0] sm:$0xff]  ;;  %v966_v37 = vld [vmem:[%s1866_s19 + $0xc8] sm:$0xff]  ;;  %v1036_v38 = vld [vmem:[%s1866_s19 + $0x2f8] sm:$0xff]  ;;  %s424_s8 = scalar_lea.vmem %s2189_s7, %s1569_s27 }
  0x48   : > { %1570 = vmatmul.mubr.msk.f32.vlgmr.msra.gmra.mxu1 %vm446_vm0, %v441_v15  ;;  %551 = vmatprep.subr.mxu1 %v445_v16  ;;  %v965_v39 = vld [vmem:[%s1866_s19 + $0xc0] sm:$0xff]  ;;  %v1035_v40 = vld [vmem:[%s1866_s19 + $0x2f0] sm:$0xff]  ;;  %v964_v41 = vld [vmem:[%s1866_s19 + $0xb8] sm:$0xff] }
  0x49   : > { %552 = vmatpush1.msra.mxu1 %v444_v17  ;;  %585 = vmatprep.mubr.f32.mxu1 %v1737_v12  ;;  %v1034_v42 = vld [vmem:[%s1866_s19 + $0x2e8] sm:$0xff]  ;;  %v963_v43 = vld [vmem:[%s1866_s19 + $0xb0] sm:$0xff]  ;;  %v1033_v44 = vld [vmem:[%s1866_s19 + $0x2e0] sm:$0xff] }
  0x4a   : > { %622 = vmatprep.subr.mxu1 %v438_v18  ;;  %1091 = vmatpush1.msra.mxu0 %v969_v34  ;;  %v962_v45 = vld [vmem:[%s1866_s19 + $0xa8] sm:$0xff]  ;;  %v1032_v46 = vld [vmem:[%s1866_s19 + $0x2d8] sm:$0xff]  ;;  %v961_v47 = vld [vmem:[%s1866_s19 + $0xa0] sm:$0xff] }
  0x4b   : > { %1092 = vmatprep.subr.mxu0 %v968_v35  ;;  %v1031_v48 = vld [vmem:[%s1866_s19 + $0x2d0] sm:$0xff]  ;;  %v960_v49 = vld [vmem:[%s1866_s19 + $0x98] sm:$0xff]  ;;  %v1030_v50 = vld [vmem:[%s1866_s19 + $0x2c8] sm:$0xff] }
  0x4c   : > { %1571 = vmatmul.mubr.msk.f32.vlgmr.msra.gmra.mxu1 %vm446_vm0, %v441_v15  ;;  %1093 = vmatpush1.msra.mxu0 %v967_v36  ;;  %v959_v51 = vld [vmem:[%s1866_s19 + $0x90] sm:$0xff]  ;;  %v1029_v52 = vld [vmem:[%s1866_s19 + $0x2c0] sm:$0xff]  ;;  %v958_v53 = vld [vmem:[%s1866_s19 + $0x88] sm:$0xff] }
  0x4d   : > { %623 = vmatpush1.msra.mxu1 %v437_v19  ;;  %660 = vmatprep.mubr.f32.mxu1 %v1737_v12  ;;  %v1028_v54 = vld [vmem:[%s1866_s19 + $0x2b8] sm:$0xff]  ;;  %v957_v55 = vld [vmem:[%s1866_s19 + $0x80] sm:$0xff]  ;;  %v1027_v56 = vld [vmem:[%s1866_s19 + $0x2b0] sm:$0xff] }
  0x4e   : > { %624 = vmatprep.subr.mxu1 %v434_v20  ;;  %1094 = vmatprep.subr.mxu0 %v966_v37  ;;  %v956_v57 = vld [vmem:[%s1866_s19 + $0x78] sm:$0xff]  ;;  %v1026_v58 = vld [vmem:[%s1866_s19 + $0x2a8] sm:$0xff]  ;;  %v955_v59 = vld [vmem:[%s1866_s19 + $0x70] sm:$0xff] }
  0x4f   : > { %625 = vmatpush1.msra.mxu1 %v433_v21  ;;  %1095 = vmatpush1.msra.mxu0 %v965_v39  ;;  %v1025_v60 = vld [vmem:[%s1866_s19 + $0x2a0] sm:$0xff]  ;;  %v954_v61 = vld [vmem:[%s1866_s19 + $0x68] sm:$0xff]  ;;  %v1024_v62 = vld [vmem:[%s1866_s19 + $0x298] sm:$0xff] }
  0x50   : > { %626 = vmatprep.subr.mxu1 %v430_v22  ;;  %1096 = vmatprep.subr.mxu0 %v964_v41  ;;  %v953_v63 = vld [vmem:[%s1866_s19 + $0x60] sm:$0xff]  ;;  %v1023_v0 = vld [vmem:[%s1866_s19 + $0x290] sm:$0xff]  ;;  %v952_v1 = vld [vmem:[%s1866_s19 + $0x58] sm:$0xff] }
  0x51   : > { %627 = vmatpush1.msra.mxu1 %v429_v23  ;;  %1097 = vmatpush1.msra.mxu0 %v963_v43  ;;  %v1022_v2 = vld [vmem:[%s1866_s19 + $0x288] sm:$0xff]  ;;  %v951_v3 = vld [vmem:[%s1866_s19 + $0x50] sm:$0xff]  ;;  %v1021_v4 = vld [vmem:[%s1866_s19 + $0x280] sm:$0xff] }
  0x52   : > { %1572 = vmatmul.mubr.msk.f32.vlgmr.msra.gmra.mxu1 %vm592_vm1, %v428_v24  ;;  %693 = vmatprep.subr.mxu1 %v440_v25  ;;  %v950_v5 = vld [vmem:[%s1866_s19 + $0x48] sm:$0xff]  ;;  %v1020_v6 = vld [vmem:[%s1866_s19 + $0x278] sm:$0xff]  ;;  %v949_v7 = vld [vmem:[%s1866_s19 + $0x40] sm:$0xff] }
  0x53   : > { %694 = vmatpush1.msra.mxu1 %v439_v26  ;;  %731 = vmatprep.mubr.f32.mxu1 %v1737_v12  ;;  %v1019_v8 = vld [vmem:[%s1866_s19 + $0x270] sm:$0xff]  ;;  %v948_v9 = vld [vmem:[%s1866_s19 + $0x38] sm:$0xff]  ;;  %v1018_v10 = vld [vmem:[%s1866_s19 + $0x268] sm:$0xff] }
  0x54   : > { %695 = vmatprep.subr.mxu1 %v436_v27  ;;  %1098 = vmatprep.subr.mxu0 %v962_v45  ;;  %v947_v11 = vld [vmem:[%s1866_s19 + $0x30] sm:$0xff]  ;;  %v1017_v12 = vld [vmem:[%s1866_s19 + $0x260] sm:$0xff]  ;;  %v946_v13 = vld [vmem:[%s1866_s19 + $0x28] sm:$0xff] }
  0x55   : > { %696 = vmatpush1.msra.mxu1 %v435_v28  ;;  %1099 = vmatpush1.msra.mxu0 %v961_v47  ;;  %v1016_v14 = vld [vmem:[%s1866_s19 + $0x258] sm:$0xff]  ;;  %v945_v15 = vld [vmem:[%s1866_s19 + $0x20] sm:$0xff]  ;;  %v1015_v16 = vld [vmem:[%s1866_s19 + $0x250] sm:$0xff] }
  0x56   : > { %697 = vmatprep.subr.mxu1 %v432_v29  ;;  %1100 = vmatprep.subr.mxu0 %v960_v49  ;;  %v944_v17 = vld [vmem:[%s1866_s19 + $0x18] sm:$0xff]  ;;  %v1014_v18 = vld [vmem:[%s1866_s19 + $0x248] sm:$0xff]  ;;  %v943_v19 = vld [vmem:[%s1866_s19 + $0x10] sm:$0xff] }
  0x57   : > { %698 = vmatpush1.msra.mxu1 %v431_v30  ;;  %1101 = vmatpush1.msra.mxu0 %v959_v51  ;;  %v1013_v20 = vld [vmem:[%s1866_s19 + $0x240] sm:$0xff]  ;;  %v942_v21 = vld [vmem:[%s1866_s19 + $0x8] sm:$0xff]  ;;  %v1012_v22 = vld [vmem:[%s1866_s19 + $0x238] sm:$0xff] }
  0x58   : > { %1573 = vmatmul.mubr.msk.f32.vlgmr.msra.gmra.mxu1 %vm592_vm1, %v428_v24  ;;  %1159 = vmatprep.subr.mxu1 %v1036_v38  ;;  %v941_v23 = vld [vmem:[%s1866_s19] sm:$0xff]  ;;  %v1011_v24 = vld [vmem:[%s1866_s19 + $0x230] sm:$0xff]  ;;  %v1004_v25 = vld [vmem:[%s1866_s19 + $0x1f8] sm:$0xff] }
  0x59   : > { %1160 = vmatpush1.msra.mxu1 %v1035_v40  ;;  %1102 = vmatprep.subr.mxu0 %v958_v53  ;;  %v1010_v26 = vld [vmem:[%s1866_s19 + $0x228] sm:$0xff]  ;;  %v1003_v27 = vld [vmem:[%s1866_s19 + $0x1f0] sm:$0xff]  ;;  %v1009_v28 = vld [vmem:[%s1866_s19 + $0x220] sm:$0xff] }
  0x5a   : > { %1161 = vmatprep.subr.mxu1 %v1034_v42  ;;  %1103 = vmatpush1.msra.mxu0 %v957_v55  ;;  %v1002_v29 = vld [vmem:[%s1866_s19 + $0x1e8] sm:$0xff]  ;;  %v1008_v30 = vld [vmem:[%s1866_s19 + $0x218] sm:$0xff]  ;;  %v1001_v31 = vld [vmem:[%s1866_s19 + $0x1e0] sm:$0xff] }
  0x5b   : > { %1162 = vmatpush1.msra.mxu1 %v1033_v44  ;;  %1104 = vmatprep.subr.mxu0 %v956_v57  ;;  %v1007_v32 = vld [vmem:[%s1866_s19 + $0x210] sm:$0xff]  ;;  %v1000_v33 = vld [vmem:[%s1866_s19 + $0x1d8] sm:$0xff]  ;;  %v1006_v34 = vld [vmem:[%s1866_s19 + $0x208] sm:$0xff] }
  0x5c   : > { %1163 = vmatprep.subr.mxu1 %v1032_v46  ;;  %1105 = vmatpush1.msra.mxu0 %v955_v59  ;;  %v999_v35 = vld [vmem:[%s1866_s19 + $0x1d0] sm:$0xff]  ;;  %v1005_v36 = vld [vmem:[%s1866_s19 + $0x200] sm:$0xff]  ;;  %v998_v37 = vld [vmem:[%s1866_s19 + $0x1c8] sm:$0xff] }
  0x5d   : > { %1164 = vmatpush1.msra.mxu1 %v1031_v48  ;;  %1106 = vmatprep.subr.mxu0 %v954_v61  ;;  %v1068_v38 = vld [vmem:[%s1866_s19 + $0x3f8] sm:$0xff]  ;;  %v997_v39 = vld [vmem:[%s1866_s19 + $0x1c0] sm:$0xff]  ;;  %v1067_v40 = vld [vmem:[%s1866_s19 + $0x3f0] sm:$0xff] }
  0x5e   : > { %1165 = vmatprep.subr.mxu1 %v1030_v50  ;;  %1107 = vmatpush1.msra.mxu0 %v953_v63  ;;  %v996_v41 = vld [vmem:[%s1866_s19 + $0x1b8] sm:$0xff]  ;;  %v1066_v42 = vld [vmem:[%s1866_s19 + $0x3e8] sm:$0xff]  ;;  %v995_v43 = vld [vmem:[%s1866_s19 + $0x1b0] sm:$0xff] }
  0x5f   : > { %1166 = vmatpush1.msra.mxu1 %v1029_v52  ;;  %1108 = vmatprep.subr.mxu0 %v952_v1  ;;  %v1065_v44 = vld [vmem:[%s1866_s19 + $0x3e0] sm:$0xff]  ;;  %v994_v45 = vld [vmem:[%s1866_s19 + $0x1a8] sm:$0xff]  ;;  %v1064_v46 = vld [vmem:[%s1866_s19 + $0x3d8] sm:$0xff] }
  0x60   : > { %1167 = vmatprep.subr.mxu1 %v1028_v54  ;;  %1109 = vmatpush1.msra.mxu0 %v951_v3  ;;  %v993_v47 = vld [vmem:[%s1866_s19 + $0x1a0] sm:$0xff]  ;;  %v1063_v48 = vld [vmem:[%s1866_s19 + $0x3d0] sm:$0xff]  ;;  %v992_v49 = vld [vmem:[%s1866_s19 + $0x198] sm:$0xff] }
  0x61   : > { %1168 = vmatpush1.msra.mxu1 %v1027_v56  ;;  %1110 = vmatprep.subr.mxu0 %v950_v5  ;;  %v1062_v50 = vld [vmem:[%s1866_s19 + $0x3c8] sm:$0xff]  ;;  %v991_v51 = vld [vmem:[%s1866_s19 + $0x190] sm:$0xff]  ;;  %v1061_v52 = vld [vmem:[%s1866_s19 + $0x3c0] sm:$0xff] }
  0x62   : > { %1169 = vmatprep.subr.mxu1 %v1026_v58  ;;  %1111 = vmatpush1.msra.mxu0 %v949_v7  ;;  %v990_v53 = vld [vmem:[%s1866_s19 + $0x188] sm:$0xff]  ;;  %v1060_v54 = vld [vmem:[%s1866_s19 + $0x3b8] sm:$0xff]  ;;  %v989_v55 = vld [vmem:[%s1866_s19 + $0x180] sm:$0xff] }
  0x63   : > { %1170 = vmatpush1.msra.mxu1 %v1025_v60  ;;  %1112 = vmatprep.subr.mxu0 %v948_v9  ;;  %v1059_v56 = vld [vmem:[%s1866_s19 + $0x3b0] sm:$0xff]  ;;  %v988_v57 = vld [vmem:[%s1866_s19 + $0x178] sm:$0xff]  ;;  %v1058_v58 = vld [vmem:[%s1866_s19 + $0x3a8] sm:$0xff] }
  0x64   : > { %1171 = vmatprep.subr.mxu1 %v1024_v62  ;;  %1113 = vmatpush1.msra.mxu0 %v947_v11  ;;  %v987_v59 = vld [vmem:[%s1866_s19 + $0x170] sm:$0xff]  ;;  %v1057_v60 = vld [vmem:[%s1866_s19 + $0x3a0] sm:$0xff]  ;;  %v986_v61 = vld [vmem:[%s1866_s19 + $0x168] sm:$0xff] }
  0x65   : > { %1172 = vmatpush1.msra.mxu1 %v1023_v0  ;;  %1114 = vmatprep.subr.mxu0 %v946_v13  ;;  %v1056_v62 = vld [vmem:[%s1866_s19 + $0x398] sm:$0xff]  ;;  %v985_v63 = vld [vmem:[%s1866_s19 + $0x160] sm:$0xff]  ;;  %v1055_v0 = vld [vmem:[%s1866_s19 + $0x390] sm:$0xff] }
  0x66   : > { %1173 = vmatprep.subr.mxu1 %v1022_v2  ;;  %1115 = vmatpush1.msra.mxu0 %v945_v15  ;;  %v984_v1 = vld [vmem:[%s1866_s19 + $0x158] sm:$0xff]  ;;  %v1054_v2 = vld [vmem:[%s1866_s19 + $0x388] sm:$0xff]  ;;  %v983_v3 = vld [vmem:[%s1866_s19 + $0x150] sm:$0xff] }
  0x67   : > { %1174 = vmatpush1.msra.mxu1 %v1021_v4  ;;  %1116 = vmatprep.subr.mxu0 %v944_v17  ;;  %v1053_v4 = vld [vmem:[%s1866_s19 + $0x380] sm:$0xff]  ;;  %v982_v5 = vld [vmem:[%s1866_s19 + $0x148] sm:$0xff]  ;;  %v980_v9 = vld [vmem:[%s1866_s19 + $0x138] sm:$0xff] }
  0x68   : > { %1175 = vmatprep.subr.mxu1 %v1020_v6  ;;  %1117 = vmatpush1.msra.mxu0 %v943_v19  ;;  %v1052_v6 = vld [vmem:[%s1866_s19 + $0x378] sm:$0xff]  ;;  %v981_v7 = vld [vmem:[%s1866_s19 + $0x140] sm:$0xff]  ;;  %v979_v11 = vld [vmem:[%s1866_s19 + $0x130] sm:$0xff] }
  0x69   : > { %1176 = vmatpush1.msra.mxu1 %v1019_v8  ;;  %1118 = vmatprep.subr.mxu0 %v942_v21  ;;  %v1051_v8 = vld [vmem:[%s1866_s19 + $0x370] sm:$0xff]  ;;  %v978_v13 = vld [vmem:[%s1866_s19 + $0x128] sm:$0xff]  ;;  %v977_v15 = vld [vmem:[%s1866_s19 + $0x120] sm:$0xff] }
  0x6a   : > { %1177 = vmatprep.subr.mxu1 %v1018_v10  ;;  %1119 = vmatpush1.msra.mxu0 %v941_v23  ;;  %v1050_v10 = vld [vmem:[%s1866_s19 + $0x368] sm:$0xff]  ;;  %v976_v17 = vld [vmem:[%s1866_s19 + $0x118] sm:$0xff]  ;;  %v975_v19 = vld [vmem:[%s1866_s19 + $0x110] sm:$0xff] }
  0x6b   : > { %1178 = vmatpush1.msra.mxu1 %v1017_v12  ;;  %1120 = vmatprep.subr.mxu0 %v1004_v25  ;;  %v1049_v12 = vld [vmem:[%s1866_s19 + $0x360] sm:$0xff]  ;;  %v974_v21 = vld [vmem:[%s1866_s19 + $0x108] sm:$0xff] }
  0x6c   : > { %1179 = vmatprep.subr.mxu1 %v1016_v14  ;;  %1121 = vmatpush2.msra.mxu0 %v1003_v27  ;;  %v1048_v14 = vld [vmem:[%s1866_s19 + $0x358] sm:$0xff]  ;;  %v973_v23 = vld [vmem:[%s1866_s19 + $0x100] sm:$0xff]  ;;  %v1042_v25 = vld [vmem:[%s1866_s19 + $0x328] sm:$0xff] }
  0x6d   : > { %1180 = vmatpush1.msra.mxu1 %v1015_v16  ;;  %1122 = vmatprep.subr.mxu0 %v1002_v29  ;;  %v1047_v16 = vld [vmem:[%s1866_s19 + $0x350] sm:$0xff]  ;;  %v1040_v27 = vld [vmem:[%s1866_s19 + $0x318] sm:$0xff]  ;;  %v1038_v29 = vld [vmem:[%s1866_s19 + $0x308] sm:$0xff] }
  0x6e   : > { %1181 = vmatprep.subr.mxu1 %v1014_v18  ;;  %1123 = vmatpush2.msra.mxu0 %v1001_v31  ;;  %v1046_v18 = vld [vmem:[%s1866_s19 + $0x348] sm:$0xff]  ;;  %v740_v31 = vlaneseq }
  0x6f   : > { %1182 = vmatpush1.msra.mxu1 %v1013_v20  ;;  %1124 = vmatprep.subr.mxu0 %v1000_v33  ;;  %v1045_v20 = vld [vmem:[%s1866_s19 + $0x340] sm:$0xff] }
  0x70   : > { %1183 = vmatprep.subr.mxu1 %v1012_v22  ;;  %1125 = vmatpush2.msra.mxu0 %v999_v35  ;;  %v1044_v22 = vld [vmem:[%s1866_s19 + $0x338] sm:$0xff] }
  0x71   : > { %1184 = vmatpush1.msra.mxu1 %v1011_v24  ;;  %1126 = vmatprep.subr.mxu0 %v998_v37  ;;  %v1043_v24 = vld [vmem:[%s1866_s19 + $0x330] sm:$0xff] }
  0x72   : > { %1185 = vmatprep.subr.mxu1 %v1010_v26  ;;  %1127 = vmatpush2.msra.mxu0 %v997_v39  ;;  %v1041_v26 = vld [vmem:[%s1866_s19 + $0x320] sm:$0xff] }
  0x73   : > { %1186 = vmatpush1.msra.mxu1 %v1009_v28  ;;  %1128 = vmatprep.subr.mxu0 %v996_v41  ;;  %v1039_v28 = vld [vmem:[%s1866_s19 + $0x310] sm:$0xff] }
  0x74   : > { %1187 = vmatprep.subr.mxu1 %v1008_v30  ;;  %1129 = vmatpush2.msra.mxu0 %v995_v43  ;;  %v1037_v30 = vld [vmem:[%s1866_s19 + $0x300] sm:$0xff]  ;;  %s2116_s19 = scalar_lea.vmem %s2188_s6, %s1616_s16 }
  0x75   : > { %1188 = vmatpush1.msra.mxu1 %v1007_v32  ;;  %1130 = vmatprep.subr.mxu0 %v994_v45  ;;  %v2026_v32 = vshrl.u32 %v740_v31, 7 }
  0x76   : > { %1189 = vmatprep.subr.mxu1 %v1006_v34  ;;  %1131 = vmatpush2.msra.mxu0 %v993_v47 }
  0x77   : > { %1190 = vmatpush1.msra.mxu1 %v1005_v36  ;;  %1132 = vmatprep.subr.mxu0 %v992_v49  ;;  %v2034_v34 = vsub.s32 0, %v2026_v32  ;;  %v2037_v36 = vld [vmem:[%s2031_s15] sm:$0x77]  ;;  %v2040_v37 = vsub.s32 4, %v2026_v32 }
  0x78   : > { %1191 = vmatprep.subr.mxu1 %v1068_v38  ;;  %1133 = vmatpush2.msra.mxu0 %v991_v51 }
  0x79   : > { %1192 = vmatpush2.msra.mxu1 %v1067_v40  ;;  %1134 = vmatprep.subr.mxu0 %v990_v53  ;;  %v743_v39 = vrot.slane %v2037_v36, %v2034_v34  ;;  %v747_v41 = vrot.slane %v2037_v36, %v2040_v37 }
  0x7a   : > { %1193 = vmatprep.subr.mxu1 %v1066_v42  ;;  %1135 = vmatpush2.msra.mxu0 %v989_v55  ;;  %v2047_v42 = vld [vmem:[%s2031_s15 + $0x8] sm:$0x77] }
  0x7b   : > { %1194 = vmatpush2.msra.mxu1 %v1065_v44  ;;  %1136 = vmatprep.subr.mxu0 %v988_v57  ;;  %v763_v43 = vrot.slane %v743_v39, %v2034_v34  ;;  %v751_v47 = vrot.slane %v2047_v42, %v2034_v34  ;;  %v755_v51 = vrot.slane %v2047_v42, %v2040_v37 }
  0x7c   : > { %1195 = vmatprep.subr.mxu1 %v1064_v46  ;;  %1137 = vmatpush2.msra.mxu0 %v987_v59  ;;  %v767_v46 = vrot.slane %v747_v41, %v2034_v34 }
  0x7d   : > { %1196 = vmatpush2.msra.mxu1 %v1063_v48  ;;  %1138 = vmatprep.subr.mxu0 %v986_v61  ;;  %v775_v59 = vrot.slane %v755_v51, %v2034_v34 }
  0x7e   : > { %1197 = vmatprep.subr.mxu1 %v1062_v50  ;;  %1139 = vmatpush2.msra.mxu0 %v985_v63 }
  0x7f   : > { %1198 = vmatpush2.msra.mxu1 %v1061_v52  ;;  %1140 = vmatprep.subr.mxu0 %v984_v1 }
  0x80   : > { %1199 = vmatprep.subr.mxu1 %v1060_v54  ;;  %1141 = vmatpush2.msra.mxu0 %v983_v3  ;;  %v771_v54 = vrot.slane %v751_v47, %v2034_v34 }
  0x81   : > { %1200 = vmatpush2.msra.mxu1 %v1059_v56  ;;  %1142 = vmatprep.subr.mxu0 %v982_v5 }
  0x82   : > { %1201 = vmatprep.subr.mxu1 %v1058_v58  ;;  %1143 = vmatpush2.msra.mxu0 %v981_v7 }
  0x83   : > { %1202 = vmatpush2.msra.mxu1 %v1057_v60  ;;  %1144 = vmatprep.subr.mxu0 %v980_v9 }
  0x84   : > { %1203 = vmatprep.subr.mxu1 %v1056_v62  ;;  %1145 = vmatpush2.msra.mxu0 %v979_v11 }
  0x85   : > { %1204 = vmatpush2.msra.mxu1 %v1055_v0  ;;  %1146 = vmatprep.subr.mxu0 %v978_v13 }
  0x86   : > { %1205 = vmatprep.subr.mxu1 %v1054_v2  ;;  %1147 = vmatpush2.msra.mxu0 %v977_v15 }
  0x87   : > { %1206 = vmatpush2.msra.mxu1 %v1053_v4  ;;  %1148 = vmatprep.subr.mxu0 %v976_v17 }
  0x88   : > { %1207 = vmatprep.subr.mxu1 %v1052_v6  ;;  %1149 = vmatpush2.msra.mxu0 %v975_v19 }
  0x89   : > { %1208 = vmatpush2.msra.mxu1 %v1051_v8  ;;  %1150 = vmatprep.subr.mxu0 %v974_v21 }
  0x8a   : > { %1209 = vmatprep.subr.mxu1 %v1050_v10  ;;  %1151 = vmatpush2.msra.mxu0 %v973_v23 }
  0x8b   : > { %1210 = vmatpush2.msra.mxu1 %v1049_v12 }
  0x8c   : > { %1211 = vmatprep.subr.mxu1 %v1048_v14 }
  0x8d   : > { %1212 = vmatpush2.msra.mxu1 %v1047_v16 }
  0x8e   : > { %1213 = vmatprep.subr.mxu1 %v1046_v18 }
  0x8f   : > { %1214 = vmatpush2.msra.mxu1 %v1045_v20 }
  0x90   : > { %1215 = vmatprep.subr.mxu1 %v1044_v22 }
  0x91   : > { %1216 = vmatpush2.msra.mxu1 %v1043_v24 }
  0x92   : > { %1217 = vmatprep.subr.mxu1 %v1042_v25 }
  0x93   : > { %1218 = vmatpush2.msra.mxu1 %v1041_v26 }
  0x94   : > { %1219 = vmatprep.subr.mxu1 %v1040_v27 }
  0x95   : > { %1220 = vmatpush2.msra.mxu1 %v1039_v28 }
  0x96   : > { %1221 = vmatprep.subr.mxu1 %v1038_v29 }
  0x97   : > { %1222 = vmatpush2.msra.mxu1 %v1037_v30 }
 0x108   : > { %v516_v33 = vpop.f32.mrf.mxu1 }
 0x10a   : > { %v518_v35 = vpop.f32.mrf.mxu1 }
 0x10c   : > { %v587_v38 = vpop.f32.mrf.mxu1 }
 0x10e   : > { %v589_v40 = vpop.f32.mrf.mxu1 }
 0x112   : > { %v662_v44 = vpop.f32.mrf.mxu1 }
 0x113   : > { %v663_v45 = vadd.f32 %v662_v44, %v516_v33 }
 0x114   : > { %v664_v48 = vpop.f32.mrf.mxu1 }
 0x115   : > { %v776_v49 = vadd.f32 %v763_v43, %v663_v45  ;;  %v665_v50 = vadd.f32 %v664_v48, %v518_v35 }
 0x117   : > { %v780_v52 = vrot.slane %v776_v49, 4  ;;  %v777_v53 = vadd.f32 %v767_v46, %v665_v50 }
 0x118   : > { %v733_v55 = vpop.f32.mrf.mxu1 }
 0x119   : > { %v781_v56 = vadd.f32 %v780_v52, %v776_v49  ;;  %v786_v57 = vrot.slane %v777_v53, 4  ;;  %v734_v58 = vadd.f32 %v733_v55, %v587_v38 }
 0x11a   : > { %v735_v60 = vpop.f32.mrf.mxu1 }
 0x11b   : > { %v782_v61 = vrot.slane %v781_v56, 2  ;;  %v787_v62 = vadd.f32 %v786_v57, %v777_v53  ;;  %v778_v63 = vadd.f32 %v771_v54, %v734_v58  ;;  %v736_v0 = vadd.f32 %v735_v60, %v589_v40 }
 0x11d   : > { %v783_v1 = vadd.f32 %v782_v61, %v781_v56  ;;  %v788_v2 = vrot.slane %v787_v62, 2  ;;  %v792_v3 = vrot.slane %v778_v63, 4  ;;  %v779_v4 = vadd.f32 %v775_v59, %v736_v0 }
 0x11f   : > { %v784_v5 = vrot.slane %v783_v1, 1  ;;  %v789_v6 = vadd.f32 %v788_v2, %v787_v62  ;;  %v793_v7 = vadd.f32 %v792_v3, %v778_v63  ;;  %v798_v8 = vrot.slane %v779_v4, 4 }
 0x121   : > { %v785_v9 = vadd.f32 %v784_v5, %v783_v1  ;;  %v794_v10 = vrot.slane %v793_v7, 2  ;;  %v799_v11 = vadd.f32 %v798_v8, %v779_v4  ;;  %v790_v12 = vrot.slane %v789_v6, 1 }
 0x122   : > { %v2073_v8 = vsub.s32 5, %v2026_v32 }
 0x123   : > { %v805_v13 = vmul.f32 0.125, %v785_v9  ;;  %v795_v14 = vadd.f32 %v794_v10, %v793_v7  ;;  %v800_v15 = vrot.slane %v799_v11, 2  ;;  %v791_v16 = vadd.f32 %v790_v12, %v789_v6 }
 0x124   : > { %v2070_v6 = vsub.s32 1, %v2026_v32  ;;  %v2076_v9 = vsub.s32 2, %v2026_v32  ;;  %v2079_v10 = vsub.s32 6, %v2026_v32  ;;  %v864_v12 = vrot.slane %v2037_v36, %v2073_v8 }
 0x125   : > { %v2057_v17 = vsub.f32 %v776_v49, %v805_v13  ;;  %v796_v18 = vrot.slane %v795_v14, 1  ;;  %v801_v19 = vadd.f32 %v800_v15, %v799_v11  ;;  %v806_v20 = vmul.f32 0.125, %v791_v16 }
 0x126   : > { %v860_v11 = vrot.slane %v2037_v36, %v2070_v6  ;;  %v900_v13 = vrot.slane %v2037_v36, %v2076_v9 }
 0x127   : > { %v813_v21 = vmul.f32 %v2057_v17, %v2057_v17  ;;  %v797_v22 = vadd.f32 %v796_v18, %v795_v14  ;;  %v802_v23 = vrot.slane %v801_v19, 1  ;;  %v810_v24 = vsub.f32 %v777_v53, %v806_v20 }
 0x128   : > { %v904_v14 = vrot.slane %v2037_v36, %v2079_v10  ;;  %v880_v15 = vrot.slane %v860_v11, %v2070_v6  ;;  %v884_v18 = vrot.slane %v864_v12, %v2070_v6  ;;  %v872_v36 = vrot.slane %v2047_v42, %v2073_v8  ;;  %v1315_v11 = vld [vmem:[%s2116_s19 + $0x28] sm:$0xff]  ;;  %v1330_v12 = vld [vmem:[%s2116_s19 + $0xa0] sm:$0xff] }
 0x129   : > { %v817_v25 = vrot.slane %v813_v21, 4  ;;  %v807_v26 = vmul.f32 0.125, %v797_v22  ;;  %v803_v27 = vadd.f32 %v802_v23, %v801_v19  ;;  %v814_v28 = vmul.f32 %v810_v24, %v810_v24 }
 0x12a   : > { %v868_v19 = vrot.slane %v2047_v42, %v2070_v6  ;;  %v924_v23 = vrot.slane %v904_v14, %v2076_v9  ;;  %v1329_v14 = vld [vmem:[%s2116_s19 + $0x98] sm:$0xff] }
 0x12b   : > { %v818_v29 = vadd.f32 %v817_v25, %v813_v21  ;;  %v2061_v30 = vsub.f32 %v778_v63, %v807_v26  ;;  %v808_v33 = vmul.f32 0.125, %v803_v27  ;;  %v823_v35 = vrot.slane %v814_v28, 4 }
 0x12c   : > { %v920_v21 = vrot.slane %v900_v13, %v2076_v9  ;;  %v908_v26 = vrot.slane %v2047_v42, %v2076_v9  ;;  %v1314_v13 = vld [vmem:[%s2116_s19 + $0x20] sm:$0xff] }
 0x12d   : > { %v819_v38 = vrot.slane %v818_v29, 2  ;;  %v815_v39 = vmul.f32 %v2061_v30, %v2061_v30  ;;  %v2065_v40 = vsub.f32 %v779_v4, %v808_v33  ;;  %v824_v41 = vadd.f32 %v823_v35, %v814_v28 }
 0x12e   : > { %v888_v28 = vrot.slane %v868_v19, %v2070_v6  ;;  %v1311_v19 = vld [vmem:[%s2116_s19 + $0x8] sm:$0xff] }
 0x12f   : > { %v820_v43 = vadd.f32 %v819_v38, %v818_v29  ;;  %v829_v44 = vrot.slane %v815_v39, 4  ;;  %v816_v45 = vmul.f32 %v2065_v40, %v2065_v40  ;;  %v825_v46 = vrot.slane %v824_v41, 2 }
 0x130   : > { %v892_v38 = vrot.slane %v872_v36, %v2070_v6 }
 0x131   : > { %v821_v47 = vrot.slane %v820_v43, 1  ;;  %v830_v48 = vadd.f32 %v829_v44, %v815_v39  ;;  %v835_v49 = vrot.slane %v816_v45, 4  ;;  %v826_v50 = vadd.f32 %v825_v46, %v824_v41 }
 0x132   : > { %v928_v41 = vrot.slane %v908_v26, %v2076_v9 }
 0x133   : > { %v822_v51 = vadd.f32 %v821_v47, %v820_v43  ;;  %v831_v52 = vrot.slane %v830_v48, 2  ;;  %v836_v53 = vadd.f32 %v835_v49, %v816_v45  ;;  %v827_v54 = vrot.slane %v826_v50, 1 }
 0x135   : > { %v841_v55 = vmul.f32 0.125, %v822_v51  ;;  %v832_v56 = vadd.f32 %v831_v52, %v830_v48  ;;  %v837_v57 = vrot.slane %v836_v53, 2  ;;  %v828_v58 = vadd.f32 %v827_v54, %v826_v50  ;;  %v1325_v51 = vld [vmem:[%s2116_s19 + $0x78] sm:$0xff]  ;;  %v1340_v52 = vld [vmem:[%s2116_s19 + $0xf0] sm:$0xff]  ;;  %v1339_v54 = vld [vmem:[%s2116_s19 + $0xe8] sm:$0xff] }
 0x137   : > { %v845_v59 = vadd.f32 1e-05, %v841_v55  ;;  %v833_v60 = vrot.slane %v832_v56, 1  ;;  %v838_v61 = vadd.f32 %v837_v57, %v836_v53  ;;  %v842_v62 = vmul.f32 0.125, %v828_v58  ;;  %v1324_v53 = vld [vmem:[%s2116_s19 + $0x70] sm:$0xff]  ;;  %v1323_v55 = vld [vmem:[%s2116_s19 + $0x68] sm:$0xff] }
 0x138   : > { %v1322_v57 = vld [vmem:[%s2116_s19 + $0x60] sm:$0xff]  ;;  %v1337_v58 = vld [vmem:[%s2116_s19 + $0xd8] sm:$0xff] }
 0x139   : > { %1655 = vrsqrt.f32 %v845_v59  ;;  %v834_v63 = vadd.f32 %v833_v60, %v832_v56  ;;  %v839_v0 = vrot.slane %v838_v61, 1  ;;  %v846_v1 = vadd.f32 1e-05, %v842_v62  ;;  %v1338_v56 = vld [vmem:[%s2116_s19 + $0xe0] sm:$0xff]  ;;  %v1321_v59 = vld [vmem:[%s2116_s19 + $0x58] sm:$0xff]  ;;  %v1336_v60 = vld [vmem:[%s2116_s19 + $0xd0] sm:$0xff] }
 0x13a   : > { %v1335_v62 = vld [vmem:[%s2116_s19 + $0xc8] sm:$0xff] }
 0x13b   : > { %v843_v2 = vmul.f32 0.125, %v834_v63  ;;  %v840_v3 = vadd.f32 %v839_v0, %v838_v61  ;;  %1657 = vrsqrt.f32 %v846_v1  ;;  %v1320_v61 = vld [vmem:[%s2116_s19 + $0x50] sm:$0xff]  ;;  %v1319_v63 = vld [vmem:[%s2116_s19 + $0x48] sm:$0xff]  ;;  %v1334_v0 = vld [vmem:[%s2116_s19 + $0xc0] sm:$0xff] }
 0x13c   : > { %v1318_v1 = vld [vmem:[%s2116_s19 + $0x40] sm:$0xff] }
 0x13d   : > { %v847_v4 = vadd.f32 1e-05, %v843_v2  ;;  %v844_v5 = vmul.f32 0.125, %v840_v3  ;;  %v1333_v2 = vld [vmem:[%s2116_s19 + $0xb8] sm:$0xff] }
 0x13e   : > { %v1317_v3 = vld [vmem:[%s2116_s19 + $0x38] sm:$0xff] }
 0x13f   : > { %1659 = vrsqrt.f32 %v847_v4  ;;  %v848_v7 = vadd.f32 1e-05, %v844_v5  ;;  %v1332_v4 = vld [vmem:[%s2116_s19 + $0xb0] sm:$0xff] }
 0x140   : > { %v1316_v5 = vld [vmem:[%s2116_s19 + $0x30] sm:$0xff] }
 0x141   : > { %1661 = vrsqrt.f32 %v848_v7  ;;  %v1331_v7 = vld [vmem:[%s2116_s19 + $0xa8] sm:$0xff] }
 0x146   : > { %v1656_v16 = vpop.eup %1655 }
 0x147   : > { %v853_v32 = vmul.f32 %v1656_v16, %v2057_v17  ;;  %v912_v17 = vrot.slane %v2047_v42, %v2079_v10  ;;  %v1328_v16 = vld [vmem:[%s2116_s19 + $0x90] sm:$0xff] }
 0x148   : > { %v1658_v20 = vpop.eup %1657 }
 0x149   : > { %v854_v22 = vmul.f32 %v1658_v20, %v810_v24  ;;  %v893_v25 = vmul.f32 %v880_v15, %v853_v32  ;;  %v932_v45 = vrot.slane %v912_v17, %v2076_v9  ;;  %v1313_v15 = vld [vmem:[%s2116_s19 + $0x18] sm:$0xff]  ;;  %v1327_v32 = vld [vmem:[%s2116_s19 + $0x88] sm:$0xff]  ;;  %v1326_v20 = vld [vmem:[%s2116_s19 + $0x80] sm:$0xff] }
 0x14b   : > { %v894_v27 = vmul.f32 %v884_v18, %v854_v22  ;;  %v933_v33 = vadd.f32 %v920_v21, %v893_v25  ;;  %v1312_v18 = vld [vmem:[%s2116_s19 + $0x10] sm:$0xff]  ;;  %v1310_v21 = vld [vmem:[%s2116_s19] sm:$0xff] }
 0x14c   : > { %v1660_v29 = vpop.eup %1659  ;;  %v427_v22 = vld [vmem:[%s2031_s15 + $0x10] sm:$0x77] }
 0x14d   : > { %v855_v35 = vmul.f32 %v1660_v29, %v2061_v30  ;;  %v934_v24 = vadd.f32 %v924_v23, %v894_v27  ;;  %v937_v46 = vmax.f32 %v933_v33, 0.0  ;;  %v1073_v23 = vrot.slane %v427_v22, %v2034_v34 }
 0x14e   : > { %v1662_v39 = vpop.eup %1661  ;;  %v1077_v25 = vrot.slane %v427_v22, %v2040_v37 }
 0x14f   : > { %v938_v43 = vmax.f32 %v934_v24, 0.0  ;;  %v856_v44 = vmul.f32 %v1662_v39, %v2065_v40  ;;  %v895_v42 = vmul.f32 %v888_v28, %v855_v35  ;;  %v1341_v40 = vld [vmem:[%s2116_s19 + $0xf8] sm:$0xff]  ;;  %v1083_v26 = vrot.slane %v1073_v23, %v2034_v34 }
 0x150   : > { %1579 = vmatprep.subr.mxu0 %v1341_v40  ;;  %v1087_v27 = vrot.slane %v1077_v25, %v2034_v34 }
 0x151   : > { %1152 = vmatprep.mubr.f32.mxu0 %v938_v43  ;;  %v896_v47 = vmul.f32 %v892_v38, %v856_v44  ;;  %v935_v48 = vadd.f32 %v928_v41, %v895_v42 }
 0x152   : > { %1153 = vmatmul.mubr.f32.vlgmr.msra.gmra.mxu0 %v937_v46 }
 0x153   : > { %v936_v30 = vadd.f32 %v932_v45, %v896_v47  ;;  %v939_v50 = vmax.f32 %v935_v48, 0.0  ;;  %1580 = vmatpush3.msra.mxu0 %v1325_v51 }
 0x154   : > { %1581 = vmatprep.subr.mxu0 %v1340_v52 }
 0x155   : > { %v940_v49 = vmax.f32 %v936_v30, 0.0  ;;  %1582 = vmatpush3.msra.mxu0 %v1324_v53 }
 0x156   : > { %1583 = vmatprep.subr.mxu0 %v1339_v54 }
 0x157   : > { %1223 = vmatprep.mubr.f32.mxu1 %v940_v49  ;;  %1584 = vmatpush3.msra.mxu0 %v1323_v55 }
 0x158   : > { %1224 = vmatmul.mubr.f32.vlgmr.msra.gmra.mxu1 %v939_v50  ;;  %1585 = vmatprep.subr.mxu0 %v1338_v56 }
 0x159   : > { %1586 = vmatpush3.msra.mxu0 %v1322_v57 }
 0x15a   : > { %1587 = vmatprep.subr.mxu0 %v1337_v58 }
 0x15b   : > { %1588 = vmatpush3.msra.mxu0 %v1321_v59 }
 0x15c   : > { %1589 = vmatprep.subr.mxu0 %v1336_v60 }
 0x15d   : > { %1590 = vmatpush3.msra.mxu0 %v1320_v61 }
 0x15e   : > { %1591 = vmatprep.subr.mxu0 %v1335_v62 }
 0x15f   : > { %1592 = vmatpush3.msra.mxu0 %v1319_v63 }
 0x160   : > { %1593 = vmatprep.subr.mxu0 %v1334_v0 }
 0x161   : > { %1594 = vmatpush3.msra.mxu0 %v1318_v1 }
 0x162   : > { %1595 = vmatprep.subr.mxu0 %v1333_v2 }
 0x163   : > { %1596 = vmatpush3.msra.mxu0 %v1317_v3 }
 0x164   : > { %1597 = vmatprep.subr.mxu0 %v1332_v4 }
 0x165   : > { %1598 = vmatpush3.msra.mxu0 %v1316_v5 }
 0x166   : > { %1599 = vmatprep.subr.mxu0 %v1331_v7  ;;  %v1271_v7 = vrot.slane %v427_v22, %v2070_v6 }
 0x167   : > { %1600 = vmatpush3.msra.mxu0 %v1315_v11  ;;  %v1275_v11 = vrot.slane %v427_v22, %v2073_v8 }
 0x168   : > { %1601 = vmatprep.subr.mxu0 %v1330_v12  ;;  %v1291_v12 = vrot.slane %v427_v22, %v2076_v9 }
 0x169   : > { %1602 = vmatpush3.msra.mxu0 %v1314_v13  ;;  %v1281_v13 = vrot.slane %v1271_v7, %v2070_v6 }
 0x16a   : > { %1603 = vmatprep.subr.mxu0 %v1329_v14  ;;  %v1295_v14 = vrot.slane %v427_v22, %v2079_v10  ;;  %v1418_v10 = vand.u32 127, %v740_v31 }
 0x16b   : > { %1604 = vmatpush3.msra.mxu0 %v1313_v15 }
 0x16c   : > { %1605 = vmatprep.subr.mxu0 %v1328_v16  ;;  %v1305_v23 = vrot.slane %v1295_v14, %v2076_v9  ;;  %vm1419_vm2 = vcmp.ge.s32.totalorder %v1418_v10, 1  ;;  %vm1420_vm3 = vcmp.lt.s32.totalorder %v1418_v10, 7  ;;  %vm1433_vm5 = vcmp.eq.s32.totalorder %v1418_v10, 0 }
 0x16d   : > { %1606 = vmatpush3.msra.mxu0 %v1312_v18  ;;  %v1285_v18 = vrot.slane %v1275_v11, %v2070_v6  ;;  %v1574_v6 = vld [vmem:[%s2116_s19 + $0x100] ss:$0 sm:$0xff]  ;;  %vm1421_vm4 = vmand %vm1419_vm2, %vm1420_vm3 }
 0x16e   : > { %1607 = vmatprep.subr.mxu0 %v1327_v32 }
 0x16f   : > { %1608 = vmatpush3.msra.mxu0 %v1311_v19  ;;  %v1301_v19 = vrot.slane %v1291_v12, %v2076_v9 }
 0x170   : > { %1609 = vmatprep.subr.mxu0 %v1326_v20 }
 0x171   : > { %1610 = vmatpush3.msra.mxu0 %v1310_v21 }
 0x212   : > { %v1154_v36 = vpop.f32.mrf.mxu0 }
 0x213   : > { %v1155_v28 = vadd.f32 %v1154_v36, %v1083_v26 }
 0x214   : > { %v1156_v17 = vpop.f32.mrf.mxu0 }
 0x215   : > { %v1157_v33 = vadd.f32 %v1156_v17, %v1087_v27 }
 0x218   : > { %v1225_v29 = vpop.f32.mrf.mxu1 }
 0x219   : > { %v1226_v35 = vadd.f32 %v1225_v29, %v1155_v28 }
 0x21a   : > { %v1227_v24 = vpop.f32.mrf.mxu1 }
 0x21b   : > { %v1230_v38 = vrot.slane %v1226_v35, 4  ;;  %v1228_v39 = vadd.f32 %v1227_v24, %v1157_v33 }
 0x21d   : > { %v1231_v41 = vadd.f32 %v1230_v38, %v1226_v35  ;;  %v1236_v43 = vrot.slane %v1228_v39, 4 }
 0x21f   : > { %v1232_v44 = vrot.slane %v1231_v41, 2  ;;  %v1237_v45 = vadd.f32 %v1236_v43, %v1228_v39 }
 0x221   : > { %v1233_v42 = vadd.f32 %v1232_v44, %v1231_v41  ;;  %v1238_v46 = vrot.slane %v1237_v45, 2 }
 0x223   : > { %v1234_v37 = vrot.slane %v1233_v42, 1  ;;  %v1239_v47 = vadd.f32 %v1238_v46, %v1237_v45 }
 0x225   : > { %v1235_v48 = vadd.f32 %v1234_v37, %v1233_v42  ;;  %v1240_v30 = vrot.slane %v1239_v47, 1 }
 0x227   : > { %v1242_v49 = vmul.f32 0.125, %v1235_v48  ;;  %v1241_v34 = vadd.f32 %v1240_v30, %v1239_v47 }
 0x229   : > { %v1244_v50 = vsub.f32 %v1226_v35, %v1242_v49  ;;  %v1243_v40 = vmul.f32 0.125, %v1241_v34 }
 0x22b   : > { %v1246_v51 = vmul.f32 %v1244_v50, %v1244_v50  ;;  %v1245_v52 = vsub.f32 %v1228_v39, %v1243_v40 }
 0x22d   : > { %v1248_v53 = vrot.slane %v1246_v51, 4  ;;  %v1247_v54 = vmul.f32 %v1245_v52, %v1245_v52 }
 0x22f   : > { %v1249_v55 = vadd.f32 %v1248_v53, %v1246_v51  ;;  %v1254_v56 = vrot.slane %v1247_v54, 4 }
 0x231   : > { %v1250_v57 = vrot.slane %v1249_v55, 2  ;;  %v1255_v58 = vadd.f32 %v1254_v56, %v1247_v54 }
 0x233   : > { %v1251_v59 = vadd.f32 %v1250_v57, %v1249_v55  ;;  %v1256_v60 = vrot.slane %v1255_v58, 2 }
 0x235   : > { %v1252_v61 = vrot.slane %v1251_v59, 1  ;;  %v1257_v62 = vadd.f32 %v1256_v60, %v1255_v58 }
 0x237   : > { %v1253_v63 = vadd.f32 %v1252_v61, %v1251_v59  ;;  %v1258_v0 = vrot.slane %v1257_v62, 1 }
 0x239   : > { %v1260_v1 = vmul.f32 0.125, %v1253_v63  ;;  %v1259_v2 = vadd.f32 %v1258_v0, %v1257_v62 }
 0x23b   : > { %v1262_v3 = vadd.f32 1e-05, %v1260_v1  ;;  %v1261_v4 = vmul.f32 0.125, %v1259_v2 }
 0x23d   : > { %1663 = vrsqrt.f32 %v1262_v3  ;;  %v1263_v5 = vadd.f32 1e-05, %v1261_v4 }
 0x23f   : > { %1665 = vrsqrt.f32 %v1263_v5 }
 0x24a   : > { %v1664_v15 = vpop.eup %1663 }
 0x24b   : > { %v1266_v16 = vmul.f32 %v1664_v15, %v1244_v50 }
 0x24c   : > { %v1666_v32 = vpop.eup %1665 }
 0x24d   : > { %v1286_v20 = vmul.f32 %v1281_v13, %v1266_v16  ;;  %v1267_v21 = vmul.f32 %v1666_v32, %v1245_v52 }
 0x24f   : > { %v1287_v25 = vmul.f32 %v1285_v18, %v1267_v21  ;;  %v1306_v8 = vadd.f32 %v1301_v19, %v1286_v20 }
 0x251   : > { %v1307_v36 = vadd.f32 %v1305_v23, %v1287_v25  ;;  %v1308_v27 = vmax.f32 %v1306_v8, 0.0 }
 0x253   : > { %v1309_v26 = vmax.f32 %v1307_v36, 0.0 }
 0x255   : > { %1411 = vmatprep.mubr.f32.mxu0 %v1309_v26 }
 0x256   : > { %1412 = vmatmul.mubr.f32.vlgmr.msra.gmra.mxu0 %v1308_v27 }
 0x316   : > { %v1611_v22 = vpop.f32.mrf.mxu0 }
 0x318   : > { %v1612_v17 = vpop.f32.mrf.mxu0 }
 0x319   : > { %v1613_v28 = vadd.f32 %v1612_v17, %v1611_v22 }
 0x31b   : > { %v1414_v29 = vadd.f32 %v1613_v28, %v1574_v6 }
 0x31d   : > { %v1422_v33 = vsel %vm1421_vm4, %v1414_v29, -inf }
 0x31e   : > { %1423 = vmax.xlane.f32.xlu0 %v1422_v33 }
 0x3a7   : > { %v1424_v9 = vpop.xlane.xlu0 %1423 }
 0x3a8   : > { %v1425_v35 = vsub.f32 %v1414_v29, %v1424_v9 }
 0x3aa   : > { %v1426_v24 = vmul.f32 1.442695, %v1425_v35 }
 0x3ac   : > { %1667 = vpow2.f32 %v1426_v24 }
 0x3b9   : > { %v1668_v38 = vpop.eup %1667 }
 0x3ba   : > { %v1428_v39 = vsel %vm1421_vm4, %v1668_v38, 0.0 }
 0x3bb   : > { %1429 = vadd.xlane.f32.xlu0 %v1428_v39 }
 0x444   : > { %v1430_v41 = vpop.xlane.xlu0 %1429 }
 0x445   : > { %1669 = vrcp.f32 %v1430_v41 }
 0x452   : > { %v1670_v31 = vpop.eup %1669 }
 0x453   : > { %v1432_v43 = vmul.f32 %v1670_v31, %v1428_v39 }
 0x455   : > { %v1434_v44 = vsel %vm1433_vm5, %v1414_v29, %v1432_v43 }
 0x456   : > { %1435 = vst [vmem:[%s424_s8] sm:$0xff] %v1434_v44 }
 0x457 PF: > { %p17_p0 = scmp.ge.s32.totalorder %s1800_s29, 4   ;;  %s2192_s24 = smov %s1723_s25 }
 0x458   : > { %s2193_s25 = smov %s1727_s26  ;;  %s2194_s26 = smov %s1810_s9 }
 0x459   : > { %s2195_s27 = smov %s1800_s29  ;;  %19 = sbr.rel (!%p17_p0) target bundleno = 3 (0x3), region = 128 }
 0x45e   :  { %1455 = vsyncpa [#allocation4], 1 }
 0x45f   :  { %1457 = vsyncpa [#allocation4 + $0x1], 1 }

</bundles_post_ra>
